<compile_context>
chip_gen: v5e
topology: v5e:2x2
jax: 0.10.0
libtpu: 0.0.40
codegen_flags: <defaults>
</compile_context>

<pallas_src>
import jax
import jax.numpy as jnp
from jax.experimental import pallas as pl
from jax.experimental.pallas import tpu as pltpu


def _round_up(x, m):
    return (x + m - 1) // m * m


def _dqn_kernel(xT_ref, w1T_ref, w2T_ref, o_ref):
    """One batch tile of y^T = W2T_aug @ relu(W1T_aug-augmented fc1).

    xT_ref : (K, TB)       fp32 inputs, batch on lanes (K = in_states, tiny).
    w1T_ref: (HPAD, K+1)   augmented fc1^T: cols 0..K-1 = W1^T, col K = b1,
                           with a 1.0 planted in the constant-1 hidden row.
    w2T_ref: (OPAD, HPAD)  augmented fc2^T: rows = W2^T, the constant-1 hidden
                           column carries b2.  OPAD = 8 sublanes.
    o_ref  : (OPAD, TB)    y^T slab, actions on sublanes, batch on lanes.
    """
    k_in = xT_ref.shape[0]

    # --- fc1 on the VPU: K rank-1 FMAs.  The bias column seeds the
    #     accumulator (and the constant-1 hidden row), so no separate bias add.
    hT = w1T_ref[:, k_in:k_in + 1] + w1T_ref[:, 0:1] * xT_ref[0:1, :]
    for k in range(1, k_in):                       # statically unrolled (K=2)
        hT = hT + w1T_ref[:, k:k + 1] * xT_ref[k:k + 1, :]
    hT = jnp.maximum(hT, 0.0)                      # (HPAD, TB)

    # --- fc2 on the MXU; b2 already folded in via the constant-1 hidden row.
    o_ref[...] = jnp.dot(w2T_ref[...], hT,
                         preferred_element_type=jnp.float32).astype(o_ref.dtype)


def prepare_dqn_params(w1, b1, w2, b2, *, hpad=128):
    """Build the augmented/transposed/padded weights ONCE per weight update.

    w1: (in_states, h1), b1: (h1,), w2: (h1, out_actions), b2: (out_actions,)
    (i.e. PyTorch weight.T layout).  Returns (w1T_aug, w2T_aug).
    """
    in_states, h1 = w1.shape
    out_actions = w2.shape[1]
    assert h1 + 1 <= hpad, "hidden (+ constant-1 unit) must fit in hpad"
    bias_row = h1                                   # index of the constant-1 unit
    kcols = in_states + 1                           # weight cols + bias col

    # fc1^T augmented: (hpad, K+1).  Rows > h1 stay zero (ReLU keeps them 0),
    # so they contribute nothing through the zero columns of w2T_aug.
    w1T_aug = jnp.zeros((hpad, kcols), jnp.float32)
    w1T_aug = w1T_aug.at[:h1, :in_states].set(w1.T.astype(jnp.float32))
    w1T_aug = w1T_aug.at[:h1, in_states].set(b1.astype(jnp.float32))
    w1T_aug = w1T_aug.at[bias_row, in_states].set(1.0)   # constant-1 hidden unit

    # fc2^T augmented: (8, hpad) — actions padded to 8 sublanes only.
    opad = _round_up(max(out_actions, 1), 8)
    w2T_aug = jnp.zeros((opad, hpad), jnp.float32)
    w2T_aug = w2T_aug.at[:out_actions, :h1].set(w2.T.astype(jnp.float32))
    w2T_aug = w2T_aug.at[:out_actions, bias_row].set(b2.astype(jnp.float32))
    return w1T_aug, w2T_aug


def dqn_forward_xT(xT, w1T_aug, w2T_aug, *, tile_b=None):
    """Core kernel call: xT (in_states, B) -> yT slab (OPAD, B_padded).

    Downstream RL code (argmax over actions, TD targets) can consume the slab
    directly; only the first `out_actions` sublanes are meaningful.
    """
    in_states, B = xT.shape
    hpad, kcols = w1T_aug.shape
    assert kcols == in_states + 1
    opad = w2T_aug.shape[0]

    if tile_b is None:
        # Single grid step: nothing to pipeline at this size.
        bp = _round_up(B, 128)
        tile_b = bp
    else:
        tile_b = _round_up(tile_b, 128)
        bp = _round_up(B, tile_b)
    if bp != B:
        xT = jnp.pad(xT, ((0, 0), (0, bp - B)))
    grid = (bp // tile_b,)

    cost = pl.CostEstimate(
        flops=2 * bp * (in_states * hpad + hpad * opad),
        transcendentals=0,
        bytes_accessed=4 * (in_states * bp + hpad * kcols + opad * hpad + opad * bp),
    )

    return pl.pallas_call(
        _dqn_kernel,
        out_shape=jax.ShapeDtypeStruct((opad, bp), jnp.float32),
        grid=grid,
        in_specs=[
            pl.BlockSpec((in_states, tile_b), lambda i: (0, i)),  # x^T: batch-tiled on lanes
            pl.BlockSpec((hpad, kcols), lambda i: (0, 0)),        # W1^T aug: resident
            pl.BlockSpec((opad, hpad), lambda i: (0, 0)),         # W2^T aug: resident
        ],
        out_specs=pl.BlockSpec((opad, tile_b), lambda i: (0, i)),
        compiler_params=pltpu.CompilerParams(
            # Only a multi-tile grid benefits from megacore splitting; a single
            # step keeps one resident copy of the weights on one core.
            dimension_semantics=("parallel",) if grid[0] > 1 else ("arbitrary",),
        ),
        cost_estimate=cost,
    )(xT, w1T_aug, w2T_aug)
    # TODO(synk): inside an RL step loop, keep w1T_aug/w2T_aug resident across
    # calls (cross-call VMEM future, P10) instead of re-DMAing ~4.5 KiB/step.


def dqn_forward(x, w1T_aug, w2T_aug, out_actions, *, tile_b=None):
    """Convenience wrapper matching the PyTorch forward: (B, in) -> (B, out)."""
    B = x.shape[0]
    xT = x.T.astype(jnp.float32)                   # tiny (K, B) reshuffle
    yT = dqn_forward_xT(xT, w1T_aug, w2T_aug, tile_b=tile_b)
    # Under jit this slice+transpose fuses with the consumer; pipelines that
    # only need per-action values should read the yT slab directly.
    return yT[:out_actions, :B].T


def init_dqn_params(key, in_states, h1_nodes, out_actions):
    """Deterministic init matching nn.Linear's default:
    U(-1/sqrt(fan_in), 1/sqrt(fan_in)) for both weight and bias."""
    k1, k2, k3, k4 = jax.random.split(key, 4)
    bound1 = 1.0 / jnp.sqrt(jnp.float32(in_states))
    bound2 = 1.0 / jnp.sqrt(jnp.float32(h1_nodes))
    # Stored as (in_features, out_features) == PyTorch weight.T
    w1 = jax.random.uniform(k1, (in_states, h1_nodes), jnp.float32, -bound1, bound1)
    b1 = jax.random.uniform(k2, (h1_nodes,), jnp.float32, -bound1, bound1)
    w2 = jax.random.uniform(k3, (h1_nodes, out_actions), jnp.float32, -bound2, bound2)
    b2 = jax.random.uniform(k4, (out_actions,), jnp.float32, -bound2, bound2)
    return w1, b1, w2, b2


def dqn_reference(x, w1, b1, w2, b2):
    h = jnp.maximum(x @ w1 + b1, 0.0)
    return h @ w2 + b2


if __name__ == "__main__":
    # MountainCar: 2-dim state, 3 actions, small hidden layer.
    # Batch = one replay batch; a multiple of 128 so no batch padding is
    # needed and the whole forward is a single grid step.
    in_states, h1_nodes, out_actions = 2, 32, 3
    batch = 256

    key = jax.random.PRNGKey(0)
    k_params, k_x = jax.random.split(key)
    w1, b1, w2, b2 = init_dqn_params(k_params, in_states, h1_nodes, out_actions)
    x = jax.random.uniform(k_x, (batch, in_states), jnp.float32, -1.2, 0.6)

    # Augmented weights built ONCE per weight update (off the per-call path).
    w1T_aug, w2T_aug = prepare_dqn_params(w1, b1, w2, b2)

    fwd = jax.jit(dqn_forward, static_argnames=("out_actions", "tile_b"))
    out = jax.block_until_ready(fwd(x, w1T_aug, w2T_aug, out_actions=out_actions))

    ref = dqn_reference(x, w1, b1, w2, b2)
    assert out.shape == (batch, out_actions)
    assert jnp.allclose(out, ref, atol=1e-5, rtol=1e-5), "mismatch vs reference"

    print("KERNEL_OK")
</pallas_src>

<mosaic_0001>
module attributes {stable_mosaic.version = 11 : i64} {
  func.func @_dqn_kernel(%arg0: i32, %arg1: memref<2x256xf32, #tpu.memory_space<vmem>>, %arg2: memref<128x3xf32, #tpu.memory_space<vmem>>, %arg3: memref<8x128xf32, #tpu.memory_space<vmem>>, %arg4: memref<8x256xf32, #tpu.memory_space<vmem>>) attributes {dimension_semantics = [#tpu.dimension_semantics<arbitrary>], iteration_bounds = array<i64: 1>, scalar_prefetch = 0 : i64, scratch_operands = 0 : i64, tpu.core_type = #tpu.core_type<tc>, window_params = [{transform_indices = @transform_0, window_bounds = array<i64: 2, 256>}, {pipeline_mode = #tpu.pipeline_mode<synchronous>, transform_indices = @transform_1, window_bounds = array<i64: 128, 3>}, {pipeline_mode = #tpu.pipeline_mode<synchronous>, transform_indices = @transform_2, window_bounds = array<i64: 8, 128>}, {transform_indices = @transform_3, window_bounds = array<i64: 8, 256>}]} {
    %c0 = arith.constant 0 : index
    %c2 = arith.constant 2 : index
    %0 = vector.load %arg2[%c0, %c2] : memref<128x3xf32, #tpu.memory_space<vmem>>, vector<128x1xf32>
    %c0_0 = arith.constant 0 : index
    %c0_1 = arith.constant 0 : index
    %1 = vector.load %arg2[%c0_0, %c0_1] : memref<128x3xf32, #tpu.memory_space<vmem>>, vector<128x1xf32>
    %c0_2 = arith.constant 0 : index
    %c0_3 = arith.constant 0 : index
    %2 = vector.load %arg1[%c0_2, %c0_3] : memref<2x256xf32, #tpu.memory_space<vmem>>, vector<1x256xf32>
    %3 = vector.broadcast %1 : vector<128x1xf32> to vector<128x256xf32>
    %4 = vector.broadcast %2 : vector<1x256xf32> to vector<128x256xf32>
    %5 = arith.mulf %3, %4 : vector<128x256xf32>
    %6 = vector.broadcast %0 : vector<128x1xf32> to vector<128x256xf32>
    %7 = arith.addf %6, %5 : vector<128x256xf32>
    %c0_4 = arith.constant 0 : index
    %c1 = arith.constant 1 : index
    %8 = vector.load %arg2[%c0_4, %c1] : memref<128x3xf32, #tpu.memory_space<vmem>>, vector<128x1xf32>
    %c1_5 = arith.constant 1 : index
    %c0_6 = arith.constant 0 : index
    %9 = vector.load %arg1[%c1_5, %c0_6] : memref<2x256xf32, #tpu.memory_space<vmem>>, vector<1x256xf32>
    %10 = vector.broadcast %8 : vector<128x1xf32> to vector<128x256xf32>
    %11 = vector.broadcast %9 : vector<1x256xf32> to vector<128x256xf32>
    %12 = arith.mulf %10, %11 : vector<128x256xf32>
    %13 = arith.addf %7, %12 : vector<128x256xf32>
    %cst = arith.constant 0.000000e+00 : f32
    %14 = vector.broadcast %cst : f32 to vector<128x256xf32>
    %15 = arith.maximumf %13, %14 : vector<128x256xf32>
    %c0_7 = arith.constant 0 : index
    %c0_8 = arith.constant 0 : index
    %16 = vector.load %arg3[%c0_7, %c0_8] : memref<8x128xf32, #tpu.memory_space<vmem>>, vector<8x128xf32>
    %cst_9 = arith.constant dense<0.000000e+00> : vector<8x256xf32>
    %17 = tpu.matmul %16, %15, %cst_9 {dimension_numbers = #tpu.dot_dimension_numbers<[1], [0], [0], [1], [0, 0, 1, 1], [], []>} : vector<8x128xf32>, vector<128x256xf32>, vector<8x256xf32> -> vector<8x256xf32>
    %c0_10 = arith.constant 0 : index
    %c0_11 = arith.constant 0 : index
    %18 = vector.load %arg4[%c0_10, %c0_11] : memref<8x256xf32, #tpu.memory_space<vmem>>, vector<8x256xf32>
    tpu.vector_store %arg4[%c0_10, %c0_11], %17 {strides = array<i32>} : memref<8x256xf32, #tpu.memory_space<vmem>>, vector<8x256xf32>,
    return
  }
  func.func @transform_0(%arg0: i32) -> (i32, i32) {
    %c0_i32 = arith.constant 0 : i32
    %c0_i32_0 = arith.constant 0 : i32
    return %c0_i32, %arg0 : i32, i32
  }
  func.func @transform_1(%arg0: i32) -> (i32, i32) {
    %c0_i32 = arith.constant 0 : i32
    %c0_i32_0 = arith.constant 0 : i32
    %c0_i32_1 = arith.constant 0 : i32
    return %c0_i32, %c0_i32_0 : i32, i32
  }
  func.func @transform_2(%arg0: i32) -> (i32, i32) {
    %c0_i32 = arith.constant 0 : i32
    %c0_i32_0 = arith.constant 0 : i32
    %c0_i32_1 = arith.constant 0 : i32
    return %c0_i32, %c0_i32_0 : i32, i32
  }
  func.func @transform_3(%arg0: i32) -> (i32, i32) {
    %c0_i32 = arith.constant 0 : i32
    %c0_i32_0 = arith.constant 0 : i32
    return %c0_i32, %arg0 : i32, i32
  }
}

</mosaic_0001>

<bundles_post_ra>
// kernel: dqn_forward.1
= control target key start
LH: loop header
LB: loop body
LE: loop exit
PB: predicated region body
PF: predicated region fallthrough
CT: control target
= control target key end

     0   :  { %v482_v0 = vmov 0   ;;  %v483_v17 = vmov 1   ;;  %v484_v18 = vmov 2   ;;  %s718_s1 = inlined_call_operand.vmem [shape: f32[128,3], index: 1, kind: input, shape index: {}]   ;;  %s719_s0 = inlined_call_operand.vmem [shape: f32[2,256], index: 0, kind: input, shape index: {}]   ;;  %s720_s2 = inlined_call_operand.vmem [shape: f32[8,128], index: 2, kind: input, shape index: {}]   ;;  %s721_s3 = inlined_call_operand.vmem [shape: f32[8,256], index: 3, kind: output, shape index: {}]  }
   0x1   :  { %464 = vset.pattern.permute.xlu2 %v482_v0  ;;  %463 = vset.pattern.permute.xlu1 %v482_v0  ;;  %v508_v1 = vld [vmem:[%s718_s1 + $0x20] sm:$0xff]  ;;  %v513_v2 = vld [vmem:[%s718_s1 + $0x10] sm:$0xff]  ;;  %v526_v4 = vld [vmem:[%s718_s1 + $0x28] sm:$0xff] }
   0x2   :  { %v518_v3 = vld [vmem:[%s718_s1] sm:$0xff]  ;;  %462 = vset.pattern.permute.xlu0 %v482_v0  ;;  %53 = vperm.xlu2 %464, %v508_v1   ;;  %v531_v5 = vld [vmem:[%s718_s1 + $0x18] sm:$0xff]  ;;  %v536_v6 = vld [vmem:[%s718_s1 + $0x8] sm:$0xff] }
   0x3   :  { %43 = vperm.xlu1 %463, %v513_v2   ;;  %33 = vperm.xlu0 %462, %v518_v3   ;;  %v22_v7 = vld [vmem:[%s718_s1 + $0x40] sm:$0xff]  ;;  %v21_v8 = vld [vmem:[%s718_s1 + $0x38] sm:$0xff]  ;;  %v20_v9 = vld [vmem:[%s718_s1 + $0x30] sm:$0xff] }
   0x4   :  { %v25_v10 = vld [vmem:[%s718_s1 + $0x58] sm:$0xff]  ;;  %v24_v11 = vld [vmem:[%s718_s1 + $0x50] sm:$0xff]  ;;  %v23_v12 = vld [vmem:[%s718_s1 + $0x48] sm:$0xff] }
   0x5   :  { %v29_v13 = vld [vmem:[%s718_s1 + $0x78] sm:$0xff]  ;;  %v27_v14 = vld [vmem:[%s718_s1 + $0x68] sm:$0xff]  ;;  %v26_v15 = vld [vmem:[%s718_s1 + $0x60] sm:$0xff] }
   0x6   :  { %v28_v16 = vld [vmem:[%s718_s1 + $0x70] sm:$0xff]  ;;  %v458_v35 = vld [vmem:[%s719_s0 + $0x1] ss:$2 sm:$0x3] }
   0x7   :  { %v30_v36 = vld [vmem:[%s719_s0] ss:$2 sm:$0x3]  ;;  %v611_v38 = vperm.slane %v458_v35, 0  ;;  %v613_v39 = vperm.slane %v458_v35, 1 }
   0x8   :  { %v615_v40 = vperm.slane %v30_v36, 0  ;;  %v617_v41 = vperm.slane %v30_v36, 1 }
   0xa   :  { %58 = vperm.xlu2 %464, %v526_v4  }
   0xb   :  { %48 = vperm.xlu1 %463, %v531_v5   ;;  %38 = vperm.xlu0 %462, %v536_v6  }
  0x12   :  { %73 = vperm.xlu2 %464, %v22_v7  }
  0x13   :  { %68 = vperm.xlu1 %463, %v21_v8   ;;  %63 = vperm.xlu0 %462, %v20_v9  }
  0x1a   :  { %88 = vperm.xlu2 %464, %v25_v10  }
  0x1b   :  { %83 = vperm.xlu1 %463, %v24_v11   ;;  %78 = vperm.xlu0 %462, %v23_v12  }
  0x22   :  { %108 = vperm.xlu2 %464, %v29_v13  }
  0x23   :  { %98 = vperm.xlu1 %463, %v27_v14   ;;  %93 = vperm.xlu0 %462, %v26_v15  }
  0x2a   :  { %466 = vset.pattern.permute.xlu2 %v483_v17 }
  0x2b   :  { %465 = vset.pattern.permute.xlu1 %v484_v18  ;;  %103 = vperm.xlu0 %462, %v28_v16  }
  0x2c   :  { %307 = vperm.xlu2 %466, %v29_v13   ;;  %209 = vperm.xlu1 %465, %v29_v13  }
  0x33   :  { %469 = vset.pattern.permute.xlu0 %v483_v17 }
  0x34   :  { %468 = vset.pattern.permute.xlu2 %v484_v18  ;;  %467 = vset.pattern.permute.xlu1 %v483_v17 }
  0x35   :  { %295 = vperm.xlu0 %469, %v26_v15   ;;  %201 = vperm.xlu2 %468, %v27_v14  }
  0x36   :  { %303 = vperm.xlu1 %467, %v28_v16  }
  0x3d   :  { %275 = vperm.xlu0 %469, %v21_v8   ;;  %197 = vperm.xlu2 %468, %v26_v15  }
  0x3e   :  { %299 = vperm.xlu1 %467, %v27_v14  }
  0x45   :  { %474 = vset.pattern.permute.xlu0 %v484_v18  ;;  %471 = vset.pattern.permute.xlu2 %v483_v17 }
  0x46   :  { %470 = vset.pattern.permute.xlu1 %v484_v18  ;;  %205 = vperm.xlu0 %474, %v28_v16  }
  0x47   :  { %291 = vperm.xlu2 %471, %v25_v10   ;;  %193 = vperm.xlu1 %470, %v25_v10  }
  0x4e   :  { %185 = vperm.xlu0 %474, %v23_v12  }
  0x4f   :  { %287 = vperm.xlu2 %471, %v24_v11   ;;  %189 = vperm.xlu1 %470, %v24_v11  }
  0x56   :  { %165 = vperm.xlu0 %474, %v508_v1  }
  0x57   :  { %473 = vset.pattern.permute.xlu2 %v484_v18  ;;  %472 = vset.pattern.permute.xlu1 %v483_v17 }
  0x58   :  { %181 = vperm.xlu2 %473, %v22_v7   ;;  %283 = vperm.xlu1 %472, %v23_v12  }
  0x5c   :  { %v572_v19 = vpop.permute.xlu2 %53 }
  0x5e   :  { %479 = vset.pattern.permute.xlu0 %v483_v17 }
  0x5f   :  { %255 = vperm.xlu0 %479, %v513_v2  }
  0x60   :  { %177 = vperm.xlu2 %473, %v21_v8   ;;  %279 = vperm.xlu1 %472, %v22_v7  }
  0x64   :  { %v575_v20 = vpop.permute.xlu2 %58 }
  0x68   :  { %476 = vset.pattern.permute.xlu2 %v483_v17  ;;  %475 = vset.pattern.permute.xlu1 %v484_v18 }
  0x69   :  { %271 = vperm.xlu2 %476, %v20_v9   ;;  %173 = vperm.xlu1 %475, %v20_v9  }
  0x6c   :  { %v579_v21 = vpop.permute.xlu2 %73 }
  0x71   :  { %267 = vperm.xlu2 %476, %v526_v4   ;;  %169 = vperm.xlu1 %475, %v526_v4  }
  0x74   :  { %v89_v24 = vpop.permute.xlu2 %88 }
  0x75   :  { %v581_v22 = vpop.permute.xlu1 %43  ;;  %v583_v23 = vpop.permute.xlu0 %33  ;;  %v138_v0 = vmul.f32 %v615_v40, %v89_v24 }
  0x79   :  { %478 = vset.pattern.permute.xlu2 %v484_v18  ;;  %477 = vset.pattern.permute.xlu1 %v483_v17 }
  0x7a   :  { %161 = vperm.xlu2 %478, %v531_v5   ;;  %263 = vperm.xlu1 %477, %v508_v1   ;;  %v139_v1 = vmul.f32 %v617_v41, %v89_v24 }
  0x7c   :  { %v109_v29 = vpop.permute.xlu2 %108 }
  0x7d   :  { %v587_v25 = vpop.permute.xlu1 %48  ;;  %v589_v26 = vpop.permute.xlu0 %38  ;;  %v146_v42 = vmul.f32 %v615_v40, %v109_v29  ;;  %v147_v43 = vmul.f32 %v617_v41, %v109_v29 }
  0x82   :  { %157 = vperm.xlu2 %478, %v513_v2   ;;  %259 = vperm.xlu1 %477, %v531_v5  }
  0x85   :  { %v593_v27 = vpop.permute.xlu1 %68  ;;  %v595_v28 = vpop.permute.xlu0 %63 }
  0x86   :  { %v308_v32 = vpop.permute.xlu2 %307 }
  0x87   :  { %v345_v44 = vmul.f32 %v611_v38, %v308_v32  ;;  %v346_v45 = vmul.f32 %v613_v39, %v308_v32 }
  0x8a   :  { %480 = vset.pattern.permute.xlu1 %v484_v18  ;;  %481 = vset.pattern.permute.xlu2 %v483_v17 }
  0x8b   :  { %153 = vperm.xlu1 %480, %v536_v6   ;;  %251 = vperm.xlu2 %481, %v536_v6  }
  0x8d   :  { %v599_v30 = vpop.permute.xlu1 %83  ;;  %v601_v31 = vpop.permute.xlu0 %78 }
  0x8f   :  { %v202_v37 = vpop.permute.xlu2 %201 }
  0x93   :  { %149 = vperm.xlu1 %480, %v518_v3   ;;  %247 = vperm.xlu2 %481, %v518_v3  }
  0x95   :  { %v99_v33 = vpop.permute.xlu1 %98  ;;  %v94_v34 = vpop.permute.xlu0 %93 }
  0x96   :  { %v142_v60 = vmul.f32 %v615_v40, %v99_v33  ;;  %v143_v61 = vmul.f32 %v617_v41, %v99_v33  ;;  %v140_v62 = vmul.f32 %v615_v40, %v94_v34  ;;  %v141_v63 = vmul.f32 %v617_v41, %v94_v34 }
  0x97   :  { %v198_v52 = vpop.permute.xlu2 %197 }
  0x98   :  { %v238_v5 = vadd.f32 %v202_v37, %v142_v60  ;;  %v239_v6 = vadd.f32 %v202_v37, %v143_v61  ;;  %v236_v9 = vadd.f32 %v198_v52, %v140_v62  ;;  %v237_v10 = vadd.f32 %v198_v52, %v141_v63 }
  0x9d   :  { %v104_v46 = vpop.permute.xlu0 %103 }
  0x9e   :  { %v210_v47 = vpop.permute.xlu1 %209  ;;  %v144_v7 = vmul.f32 %v615_v40, %v104_v46  ;;  %v145_v8 = vmul.f32 %v617_v41, %v104_v46 }
  0x9f   :  { %v242_v48 = vadd.f32 %v210_v47, %v146_v42  ;;  %v243_v49 = vadd.f32 %v210_v47, %v147_v43 }
  0xa1   :  { %v377_v50 = vadd.f32 %v345_v44, %v242_v48  ;;  %v378_v51 = vadd.f32 %v346_v45, %v243_v49  ;;  %v292_v57 = vpop.permute.xlu2 %291 }
  0xa2   :  { %v337_v24 = vmul.f32 %v611_v38, %v292_v57  ;;  %v338_v29 = vmul.f32 %v613_v39, %v292_v57 }
  0xa3   :  { %v409_v53 = vmax.f32 %v377_v50, 0.0  ;;  %v410_v54 = vmax.f32 %v378_v51, 0.0  ;;  %v136_v50 = vmul.f32 %v615_v40, %v599_v30  ;;  %v137_v51 = vmul.f32 %v617_v41, %v599_v30 }
  0xa5   :  { %412 = vmatpush.msra.mxu0 %v409_v53  ;;  %432 = vmatpush.msra.mxu1 %v410_v54 }
  0xa7   :  { %v296_v55 = vpop.permute.xlu0 %295 }
  0xa8   :  { %v304_v56 = vpop.permute.xlu1 %303  ;;  %v339_v11 = vmul.f32 %v611_v38, %v296_v55  ;;  %v340_v12 = vmul.f32 %v613_v39, %v296_v55 }
  0xa9   :  { %v288_v2 = vpop.permute.xlu2 %287  ;;  %v343_v14 = vmul.f32 %v611_v38, %v304_v56  ;;  %v344_v15 = vmul.f32 %v613_v39, %v304_v56 }
  0xaa   :  { %v371_v44 = vadd.f32 %v339_v11, %v236_v9  ;;  %v372_v45 = vadd.f32 %v340_v12, %v237_v10  ;;  %v335_v56 = vmul.f32 %v611_v38, %v288_v2  ;;  %v336_v57 = vmul.f32 %v613_v39, %v288_v2 }
  0xab   :  { %v135_v2 = vmul.f32 %v617_v41, %v601_v31 }
  0xac   :  { %v403_v54 = vmax.f32 %v371_v44, 0.0  ;;  %v404_v55 = vmax.f32 %v372_v45, 0.0 }
  0xaf   :  { %v623_v58 = vpop.permute.xlu0 %275 }
  0xb0   :  { %v300_v59 = vpop.permute.xlu1 %299 }
  0xb1   :  { %v341_v3 = vmul.f32 %v611_v38, %v300_v59  ;;  %v342_v4 = vmul.f32 %v613_v39, %v300_v59 }
  0xb2   :  { %v182_v52 = vpop.permute.xlu2 %181 }
  0xb3   :  { %v373_v32 = vadd.f32 %v341_v3, %v238_v5  ;;  %v374_v33 = vadd.f32 %v342_v4, %v239_v6  ;;  %v134_v4 = vmul.f32 %v615_v40, %v601_v31  ;;  %v132_v31 = vmul.f32 %v615_v40, %v579_v21 }
  0xb5   :  { %v405_v46 = vmax.f32 %v373_v32, 0.0  ;;  %v406_v47 = vmax.f32 %v374_v33, 0.0 }
  0xb8   :  { %v206_v13 = vpop.permute.xlu0 %205 }
  0xb9   :  { %v240_v16 = vadd.f32 %v206_v13, %v144_v7  ;;  %v241_v17 = vadd.f32 %v206_v13, %v145_v8  ;;  %v194_v18 = vpop.permute.xlu1 %193  ;;  %v130_v13 = vmul.f32 %v615_v40, %v593_v27 }
  0xba   :  { %v234_v34 = vadd.f32 %v194_v18, %v138_v0  ;;  %v235_v35 = vadd.f32 %v194_v18, %v139_v1  ;;  %v178_v5 = vpop.permute.xlu2 %177  ;;  %v329_v18 = vmul.f32 %v611_v38, %v623_v58 }
  0xbb   :  { %v375_v36 = vadd.f32 %v343_v14, %v240_v16  ;;  %v376_v37 = vadd.f32 %v344_v15, %v241_v17  ;;  %v131_v14 = vmul.f32 %v617_v41, %v593_v27  ;;  %v133_v17 = vmul.f32 %v617_v41, %v579_v21 }
  0xbc   :  { %v369_v48 = vadd.f32 %v337_v24, %v234_v34  ;;  %v370_v49 = vadd.f32 %v338_v29, %v235_v35  ;;  %v330_v24 = vmul.f32 %v613_v39, %v623_v58  ;;  %v226_v29 = vadd.f32 %v178_v5, %v130_v13 }
  0xbd   :  { %v407_v42 = vmax.f32 %v375_v36, 0.0  ;;  %v408_v43 = vmax.f32 %v376_v37, 0.0  ;;  %v227_v32 = vadd.f32 %v178_v5, %v131_v14  ;;  %v228_v34 = vadd.f32 %v182_v52, %v132_v31 }
  0xbe   :  { %v401_v61 = vmax.f32 %v369_v48, 0.0  ;;  %v402_v62 = vmax.f32 %v370_v49, 0.0  ;;  %v229_v35 = vadd.f32 %v182_v52, %v133_v17  ;;  %v128_v48 = vmul.f32 %v615_v40, %v595_v28 }
  0xbf   :  { %413 = vmatpush.msra.mxu0 %v407_v42  ;;  %433 = vmatpush.msra.mxu1 %v408_v43  ;;  %v361_v43 = vadd.f32 %v329_v18, %v226_v29  ;;  %v362_v44 = vadd.f32 %v330_v24, %v227_v32  ;;  %v129_v49 = vmul.f32 %v617_v41, %v595_v28 }
  0xc0   :  { %v186_v3 = vpop.permute.xlu0 %185  ;;  %v127_v28 = vmul.f32 %v617_v41, %v575_v20  ;;  %v120_v17 = vmul.f32 %v615_v40, %v581_v22  ;;  %v121_v18 = vmul.f32 %v617_v41, %v581_v22  ;;  %v123_v32 = vmul.f32 %v617_v41, %v587_v25 }
  0xc1   :  { %v190_v53 = vpop.permute.xlu1 %189  ;;  %414 = vmatpush.msra.mxu0 %v405_v46  ;;  %434 = vmatpush.msra.mxu1 %v406_v47  ;;  %v230_v7 = vadd.f32 %v186_v3, %v134_v4  ;;  %v231_v8 = vadd.f32 %v186_v3, %v135_v2  ;;  %v393_v58 = vmax.f32 %v361_v43, 0.0  ;;  %v394_v47 = vmax.f32 %v362_v44, 0.0 }
  0xc2   :  { %v232_v59 = vadd.f32 %v190_v53, %v136_v50  ;;  %v233_v60 = vadd.f32 %v190_v53, %v137_v51 }
  0xc3   :  { %415 = vmatpush.msra.mxu0 %v403_v54  ;;  %435 = vmatpush.msra.mxu1 %v404_v55  ;;  %v272_v33 = vpop.permute.xlu2 %271 }
  0xc4   :  { %v367_v63 = vadd.f32 %v335_v56, %v232_v59  ;;  %v368_v0 = vadd.f32 %v336_v57, %v233_v60  ;;  %v327_v50 = vmul.f32 %v611_v38, %v272_v33  ;;  %v328_v51 = vmul.f32 %v613_v39, %v272_v33 }
  0xc5   :  { %416 = vmatpush.msra.mxu0 %v401_v61  ;;  %436 = vmatpush.msra.mxu1 %v402_v62  ;;  %v126_v61 = vmul.f32 %v615_v40, %v575_v20  ;;  %v124_v20 = vmul.f32 %v615_v40, %v572_v19 }
  0xc6   :  { %v399_v30 = vmax.f32 %v367_v63, 0.0  ;;  %v400_v1 = vmax.f32 %v368_v0, 0.0 }
  0xc8   :  { %417 = vmatpush.msra.mxu0 %v399_v30  ;;  %437 = vmatpush.msra.mxu1 %v400_v1  ;;  %v166_v5 = vpop.permute.xlu0 %165 }
  0xca   :  { %v284_v6 = vpop.permute.xlu1 %283 }
  0xcb   :  { %v333_v9 = vmul.f32 %v611_v38, %v284_v6  ;;  %v334_v10 = vmul.f32 %v613_v39, %v284_v6  ;;  %v268_v53 = vpop.permute.xlu2 %267 }
  0xcc   :  { %v325_v63 = vmul.f32 %v611_v38, %v268_v53  ;;  %v326_v0 = vmul.f32 %v613_v39, %v268_v53 }
  0xcd   :  { %v365_v11 = vadd.f32 %v333_v9, %v230_v7  ;;  %v366_v12 = vadd.f32 %v334_v10, %v231_v8  ;;  %v125_v8 = vmul.f32 %v617_v41, %v572_v19  ;;  %v220_v10 = vadd.f32 %v166_v5, %v124_v20 }
  0xce   :  { %v122_v19 = vmul.f32 %v615_v40, %v587_v25 }
  0xcf   :  { %v397_v15 = vmax.f32 %v365_v11, 0.0  ;;  %v398_v16 = vmax.f32 %v366_v12, 0.0  ;;  %v221_v11 = vadd.f32 %v166_v5, %v125_v8 }
  0xd1   :  { %418 = vmatpush.msra.mxu0 %v397_v15  ;;  %438 = vmatpush.msra.mxu1 %v398_v16  ;;  %v256_v14 = vpop.permute.xlu0 %255 }
  0xd2   :  { %v280_v27 = vpop.permute.xlu1 %279  ;;  %v319_v33 = vmul.f32 %v611_v38, %v256_v14 }
  0xd3   :  { %v331_v36 = vmul.f32 %v611_v38, %v280_v27  ;;  %v332_v37 = vmul.f32 %v613_v39, %v280_v27 }
  0xd4   :  { %v162_v3 = vpop.permute.xlu2 %161 }
  0xd5   :  { %v363_v42 = vadd.f32 %v331_v36, %v228_v34  ;;  %v364_v21 = vadd.f32 %v332_v37, %v229_v35  ;;  %v320_v35 = vmul.f32 %v613_v39, %v256_v14  ;;  %v218_v37 = vadd.f32 %v162_v3, %v122_v19 }
  0xd7   :  { %v395_v45 = vmax.f32 %v363_v42, 0.0  ;;  %v396_v46 = vmax.f32 %v364_v21, 0.0  ;;  %v219_v42 = vadd.f32 %v162_v3, %v123_v32 }
  0xd9   :  { %419 = vmatpush.msra.mxu0 %v395_v45  ;;  %439 = vmatpush.msra.mxu1 %v396_v46 }
  0xdb   :  { %v174_v52 = vpop.permute.xlu1 %173  ;;  %420 = vmatpush.msra.mxu0 %v393_v58  ;;  %440 = vmatpush.msra.mxu1 %v394_v47 }
  0xdc   :  { %v224_v54 = vadd.f32 %v174_v52, %v128_v48  ;;  %v225_v55 = vadd.f32 %v174_v52, %v129_v49  ;;  %v158_v31 = vpop.permute.xlu2 %157 }
  0xdd   :  { %v216_v27 = vadd.f32 %v158_v31, %v120_v17  ;;  %v217_v34 = vadd.f32 %v158_v31, %v121_v18 }
  0xde   :  { %v359_v56 = vadd.f32 %v327_v50, %v224_v54  ;;  %v360_v57 = vadd.f32 %v328_v51, %v225_v55  ;;  %v118_v50 = vmul.f32 %v615_v40, %v589_v26  ;;  %v119_v51 = vmul.f32 %v617_v41, %v589_v26 }
  0xdf   :  { %v351_v45 = vadd.f32 %v319_v33, %v216_v27  ;;  %v352_v46 = vadd.f32 %v320_v35, %v217_v34  ;;  %v117_v26 = vmul.f32 %v617_v41, %v583_v23 }
  0xe0   :  { %v391_v59 = vmax.f32 %v359_v56, 0.0  ;;  %v392_v60 = vmax.f32 %v360_v57, 0.0 }
  0xe1   :  { %v383_v48 = vmax.f32 %v351_v45, 0.0  ;;  %v384_v49 = vmax.f32 %v352_v46, 0.0 }
  0xe2   :  { %421 = vmatpush.msra.mxu0 %v391_v59  ;;  %441 = vmatpush.msra.mxu1 %v392_v60 }
  0xe3   :  { %v170_v62 = vpop.permute.xlu1 %169 }
  0xe4   :  { %v222_v30 = vadd.f32 %v170_v62, %v126_v61  ;;  %v223_v1 = vadd.f32 %v170_v62, %v127_v28  ;;  %v116_v62 = vmul.f32 %v615_v40, %v583_v23  ;;  %v411_v40 = vld [vmem:[%s720_s2] sm:$0xff] }
  0xe5   :  { %v252_v25 = vpop.permute.xlu2 %251 }
  0xe6   :  { %v357_v4 = vadd.f32 %v325_v63, %v222_v30  ;;  %v358_v2 = vadd.f32 %v326_v0, %v223_v1  ;;  %v317_v52 = vmul.f32 %v611_v38, %v252_v25  ;;  %v318_v53 = vmul.f32 %v613_v39, %v252_v25 }
  0xe8   :  { %v389_v6 = vmax.f32 %v357_v4, 0.0  ;;  %v390_v7 = vmax.f32 %v358_v2, 0.0 }
  0xea   :  { %422 = vmatpush.msra.mxu0 %v389_v6  ;;  %442 = vmatpush.msra.mxu1 %v390_v7 }
  0xec   :  { %v264_v9 = vpop.permute.xlu1 %263 }
  0xed   :  { %v323_v12 = vmul.f32 %v611_v38, %v264_v9  ;;  %v324_v13 = vmul.f32 %v613_v39, %v264_v9  ;;  %v248_v28 = vpop.permute.xlu2 %247 }
  0xee   :  { %v315_v0 = vmul.f32 %v611_v38, %v248_v28  ;;  %v316_v30 = vmul.f32 %v613_v39, %v248_v28 }
  0xef   :  { %v355_v15 = vadd.f32 %v323_v12, %v220_v10  ;;  %v356_v16 = vadd.f32 %v324_v13, %v221_v11 }
  0xf1   :  { %v387_v24 = vmax.f32 %v355_v15, 0.0  ;;  %v388_v29 = vmax.f32 %v356_v16, 0.0 }
  0xf3   :  { %423 = vmatpush.msra.mxu0 %v387_v24  ;;  %443 = vmatpush.msra.mxu1 %v388_v29 }
  0xf4   :  { %v260_v36 = vpop.permute.xlu1 %259 }
  0xf5   :  { %v321_v22 = vmul.f32 %v611_v38, %v260_v36  ;;  %v322_v21 = vmul.f32 %v613_v39, %v260_v36 }
  0xf7   :  { %v353_v43 = vadd.f32 %v321_v22, %v218_v37  ;;  %v354_v44 = vadd.f32 %v322_v21, %v219_v42 }
  0xf9   :  { %v385_v58 = vmax.f32 %v353_v43, 0.0  ;;  %v386_v47 = vmax.f32 %v354_v44, 0.0 }
  0xfb   :  { %424 = vmatpush.msra.mxu0 %v385_v58  ;;  %444 = vmatpush.msra.mxu1 %v386_v47 }
  0xfd   :  { %v154_v54 = vpop.permute.xlu1 %153  ;;  %425 = vmatpush.msra.mxu0 %v383_v48  ;;  %445 = vmatpush.msra.mxu1 %v384_v49 }
  0xfe   :  { %v214_v55 = vadd.f32 %v154_v54, %v118_v50  ;;  %v215_v56 = vadd.f32 %v154_v54, %v119_v51 }
 0x100   :  { %v349_v57 = vadd.f32 %v317_v52, %v214_v55  ;;  %v350_v59 = vadd.f32 %v318_v53, %v215_v56 }
 0x102   :  { %v381_v60 = vmax.f32 %v349_v57, 0.0  ;;  %v382_v61 = vmax.f32 %v350_v59, 0.0 }
 0x104   :  { %426 = vmatpush.msra.mxu0 %v381_v60  ;;  %446 = vmatpush.msra.mxu1 %v382_v61 }
 0x105   :  { %v150_v63 = vpop.permute.xlu1 %149 }
 0x106   :  { %v212_v1 = vadd.f32 %v150_v63, %v116_v62  ;;  %v213_v3 = vadd.f32 %v150_v63, %v117_v26 }
 0x108   :  { %v347_v4 = vadd.f32 %v315_v0, %v212_v1  ;;  %v348_v2 = vadd.f32 %v316_v30, %v213_v3 }
 0x10a   :  { %v379_v5 = vmax.f32 %v347_v4, 0.0  ;;  %v380_v6 = vmax.f32 %v348_v2, 0.0 }
 0x10c   :  { %427 = vmatpush.msra.mxu0 %v379_v5  ;;  %447 = vmatpush.msra.mxu1 %v380_v6 }
 0x10d   :  { %428 = vmatmul.f32.vlgmr.msra.gmra.mxu0 %v411_v40  ;;  %448 = vmatmul.f32.vlgmr.msra.gmra.mxu1 %v411_v40 }
 0x18a   :  { %v429_v23 = vpop.f32.mrf.mxu0  ;;  %v449_v41 = vpop.f32.mrf.mxu1 }
 0x18b   :  { %452 = vst [vmem:[%s721_s3] sm:$0xff] %v429_v23 }
 0x18c   :  { %453 = vst [vmem:[%s721_s3 + $0x8] sm:$0xff] %v449_v41 }

</bundles_post_ra>
